<compile_context>
chip_gen: v7x
topology: tpu7x:2x2x1
jax: 0.10.0
libtpu: 0.0.40
codegen_flags: <defaults>
</compile_context>

<pallas_src>
import jax
import jax.numpy as jnp
from jax.experimental import pallas as pl
from jax.experimental.pallas import tpu as pltpu


def _na_keys(num_nodes, allow_non_adjacent):
    """Non-adjacent edge list (i -> j) over 'nodes' 0..num_nodes-1."""
    if not allow_non_adjacent:
        return []
    return [(i, j) for i in range(num_nodes - 2) for j in range(i + 2, num_nodes)]


def _fuse_params(std_weights, std_biases, na_weights, na_biases, sizes,
                 allow_non_adjacent):
    """Per destination node t, concatenate all incoming weights along K into one
    (sum_K, N_t) matrix and fold all incoming biases into a single (1, N_t).

    Source order per node: [t-1 (standard edge), 0, 1, ..., t-2 (skips)] —
    this MUST match the activation-concat order used inside the kernel.
    """
    na_keys = _na_keys(len(sizes), allow_non_adjacent)
    na_map = {k: (na_weights[t], na_biases[t]) for t, k in enumerate(na_keys)}
    L = len(sizes) - 1                       # number of destination nodes

    fused_w, fused_b = [], []
    for t in range(1, L + 1):
        ws = [std_weights[t - 1]]
        b = std_biases[t - 1]
        if allow_non_adjacent:
            for j in range(t - 1):           # every j with j + 2 <= t
                w_na, b_na = na_map[(j, t)]
                ws.append(w_na)
                b = b + b_na                 # bias folding (free, host side)
        fused_w.append(jnp.concatenate(ws, axis=0) if len(ws) > 1 else ws[0])
        fused_b.append(b)
    return fused_w, fused_b


def _make_kernel(num_layers, allow_non_adjacent):
    """Builds a Pallas kernel specialized to the (fused) network topology."""
    L = num_layers

    def kernel(*refs):
        # ref layout: x, W_fused[0..L), b_fused[0..L), out
        x_ref = refs[0]
        w_refs = refs[1:1 + L]
        b_refs = refs[1 + L:1 + 2 * L]
        out_ref = refs[-1]

        acts = [x_ref[...]]                  # node 0 activation = input (f32)
        for t in range(1, L + 1):
            if allow_non_adjacent and t >= 2:
                # One wide matmul per node: concat activations of all source
                # nodes along the lane axis, order [t-1, 0, 1, ..., t-2]
                # (matches the weight concat built host-side).
                inp = jnp.concatenate([acts[t - 1]] + acts[:t - 1], axis=-1)
            else:
                inp = acts[t - 1]
            y = (jnp.dot(inp, w_refs[t - 1][...],
                         preferred_element_type=jnp.float32)
                 + b_refs[t - 1][...])
            if t < L:
                y = jnp.maximum(y, 0.0)      # ACTIVATION_FN = relu
            acts.append(y)

        out_ref[...] = acts[L].astype(out_ref.dtype)

    return kernel


def net_forward_pallas(x, std_weights, std_biases, na_weights, na_biases,
                       sizes, allow_non_adjacent):
    """Runs the whole Net forward pass in a single grid-less Pallas kernel."""
    L = len(sizes) - 1
    fused_w, fused_b = _fuse_params(std_weights, std_biases,
                                    na_weights, na_biases,
                                    sizes, allow_non_adjacent)
    kernel = _make_kernel(L, allow_non_adjacent)

    batch = x.shape[0]
    out_size = sizes[-1]
    inputs = [x] + fused_w + fused_b

    # All operands are tiny (tens of KiB): keep everything resident in VMEM,
    # no grid, no pipelining.  If the network is scaled up, add a batch grid
    # axis marked "parallel" and set pltpu.CompilerParams(vmem_limit_bytes=...).
    vmem = pltpu.MemorySpace.VMEM
    return pl.pallas_call(
        kernel,
        out_shape=jax.ShapeDtypeStruct((batch, out_size), jnp.float32),
        in_specs=[pl.BlockSpec(memory_space=vmem) for _ in inputs],
        out_specs=pl.BlockSpec(memory_space=vmem),
    )(*inputs)


def net_forward_ref(x, std_weights, std_biases, na_weights, na_biases,
                    sizes, allow_non_adjacent):
    """Pure-JAX reference mirroring the PyTorch forward exactly (unfused)."""
    na_keys = _na_keys(len(sizes), allow_non_adjacent)
    na_map = {k: (na_weights[t], na_biases[t]) for t, k in enumerate(na_keys)}
    depth = len(sizes) - 1
    outputs = [x]
    for i in range(depth - 1):
        y = outputs[i] @ std_weights[i] + std_biases[i]
        for j in range(i):
            if (j, i + 1) in na_map:
                w, b = na_map[(j, i + 1)]
                y = y + outputs[j] @ w + b
        y = jnp.maximum(y, 0.0)
        outputs.append(y)
    y = outputs[-1] @ std_weights[-1] + std_biases[-1]
    for j in range(depth - 1):
        if (j, depth) in na_map:
            w, b = na_map[(j, depth)]
            y = y + outputs[j] @ w + b
    return y


def init_params(key, sizes, allow_non_adjacent):
    """Deterministic synthetic parameter init (shapes match nn.Linear)."""
    std_weights, std_biases = [], []
    for in_s, out_s in zip(sizes[:-1], sizes[1:]):
        key, kw, kb = jax.random.split(key, 3)
        std_weights.append(
            jax.random.normal(kw, (in_s, out_s), jnp.float32) * 0.1)
        std_biases.append(
            jax.random.normal(kb, (1, out_s), jnp.float32) * 0.1)

    na_weights, na_biases = [], []
    for (i, j) in _na_keys(len(sizes), allow_non_adjacent):
        key, kw, kb = jax.random.split(key, 3)
        na_weights.append(
            jax.random.normal(kw, (sizes[i], sizes[j]), jnp.float32) * 0.1)
        na_biases.append(
            jax.random.normal(kb, (1, sizes[j]), jnp.float32) * 0.1)
    return std_weights, std_biases, na_weights, na_biases


if __name__ == "__main__":
    # Shapes consistent with the module's constructor:
    # Net(input_size=32, hidden_layers=[64, 48], output_size=16,
    #     allow_non_adjacent=...)
    input_size = 32
    hidden_layers = [64, 48]
    output_size = 16
    batch = 8
    sizes = [input_size] + hidden_layers + [output_size]

    key = jax.random.PRNGKey(0)
    key, kx = jax.random.split(key)
    x = jax.random.normal(kx, (batch, input_size), jnp.float32)

    for allow_non_adjacent in (True, False):
        std_w, std_b, na_w, na_b = init_params(key, sizes, allow_non_adjacent)

        out = net_forward_pallas(x, std_w, std_b, na_w, na_b,
                                 sizes, allow_non_adjacent)
        out = jax.block_until_ready(out)

        ref = net_forward_ref(x, std_w, std_b, na_w, na_b,
                              sizes, allow_non_adjacent)
        assert out.shape == (batch, output_size)
        assert jnp.allclose(out, ref, atol=1e-3, rtol=1e-3), \
            f"mismatch vs reference (allow_non_adjacent={allow_non_adjacent})"

    print("KERNEL_OK")
</pallas_src>

<mosaic_0001>
module attributes {stable_mosaic.version = 11 : i64} {
  func.func @kernel(%arg0: memref<8x32xf32, #tpu.memory_space<vmem>>, %arg1: memref<32x64xf32, #tpu.memory_space<vmem>>, %arg2: memref<96x48xf32, #tpu.memory_space<vmem>>, %arg3: memref<144x16xf32, #tpu.memory_space<vmem>>, %arg4: memref<1x64xf32, #tpu.memory_space<vmem>>, %arg5: memref<1x48xf32, #tpu.memory_space<vmem>>, %arg6: memref<1x16xf32, #tpu.memory_space<vmem>>, %arg7: memref<8x16xf32, #tpu.memory_space<vmem>>) attributes {dimension_semantics = [], scalar_prefetch = 0 : i64, scratch_operands = 0 : i64, tpu.core_type = #tpu.core_type<tc>} {
    %c0 = arith.constant 0 : index
    %c0_0 = arith.constant 0 : index
    %0 = vector.load %arg0[%c0, %c0_0] : memref<8x32xf32, #tpu.memory_space<vmem>>, vector<8x32xf32>
    %c0_1 = arith.constant 0 : index
    %c0_2 = arith.constant 0 : index
    %1 = vector.load %arg1[%c0_1, %c0_2] : memref<32x64xf32, #tpu.memory_space<vmem>>, vector<32x64xf32>
    %cst = arith.constant dense<0.000000e+00> : vector<8x64xf32>
    %2 = tpu.matmul %0, %1, %cst {dimension_numbers = #tpu.dot_dimension_numbers<[1], [0], [0], [1], [0, 0, 1, 1], [], []>} : vector<8x32xf32>, vector<32x64xf32>, vector<8x64xf32> -> vector<8x64xf32>
    %c0_3 = arith.constant 0 : index
    %c0_4 = arith.constant 0 : index
    %3 = vector.load %arg4[%c0_3, %c0_4] : memref<1x64xf32, #tpu.memory_space<vmem>>, vector<1x64xf32>
    %4 = vector.broadcast %3 : vector<1x64xf32> to vector<8x64xf32>
    %5 = arith.addf %2, %4 : vector<8x64xf32>
    %cst_5 = arith.constant 0.000000e+00 : f32
    %6 = vector.broadcast %cst_5 : f32 to vector<8x64xf32>
    %7 = arith.maximumf %5, %6 : vector<8x64xf32>
    %8 = tpu.concatenate %7, %0 in 1 : vector<8x64xf32>, vector<8x32xf32> -> vector<8x96xf32>
    %c0_6 = arith.constant 0 : index
    %c0_7 = arith.constant 0 : index
    %9 = vector.load %arg2[%c0_6, %c0_7] : memref<96x48xf32, #tpu.memory_space<vmem>>, vector<96x48xf32>
    %cst_8 = arith.constant dense<0.000000e+00> : vector<8x48xf32>
    %10 = tpu.matmul %8, %9, %cst_8 {dimension_numbers = #tpu.dot_dimension_numbers<[1], [0], [0], [1], [0, 0, 1, 1], [], []>} : vector<8x96xf32>, vector<96x48xf32>, vector<8x48xf32> -> vector<8x48xf32>
    %c0_9 = arith.constant 0 : index
    %c0_10 = arith.constant 0 : index
    %11 = vector.load %arg5[%c0_9, %c0_10] : memref<1x48xf32, #tpu.memory_space<vmem>>, vector<1x48xf32>
    %12 = vector.broadcast %11 : vector<1x48xf32> to vector<8x48xf32>
    %13 = arith.addf %10, %12 : vector<8x48xf32>
    %cst_11 = arith.constant 0.000000e+00 : f32
    %14 = vector.broadcast %cst_11 : f32 to vector<8x48xf32>
    %15 = arith.maximumf %13, %14 : vector<8x48xf32>
    %16 = tpu.concatenate %15, %0, %7 in 1 : vector<8x48xf32>, vector<8x32xf32>, vector<8x64xf32> -> vector<8x144xf32>
    %c0_12 = arith.constant 0 : index
    %c0_13 = arith.constant 0 : index
    %17 = vector.load %arg3[%c0_12, %c0_13] : memref<144x16xf32, #tpu.memory_space<vmem>>, vector<144x16xf32>
    %cst_14 = arith.constant dense<0.000000e+00> : vector<8x16xf32>
    %18 = tpu.matmul %16, %17, %cst_14 {dimension_numbers = #tpu.dot_dimension_numbers<[1], [0], [0], [1], [0, 0, 1, 1], [], []>} : vector<8x144xf32>, vector<144x16xf32>, vector<8x16xf32> -> vector<8x16xf32>
    %c0_15 = arith.constant 0 : index
    %c0_16 = arith.constant 0 : index
    %19 = vector.load %arg6[%c0_15, %c0_16] : memref<1x16xf32, #tpu.memory_space<vmem>>, vector<1x16xf32>
    %20 = vector.broadcast %19 : vector<1x16xf32> to vector<8x16xf32>
    %21 = arith.addf %18, %20 : vector<8x16xf32>
    %c0_17 = arith.constant 0 : index
    %c0_18 = arith.constant 0 : index
    %22 = vector.load %arg7[%c0_17, %c0_18] : memref<8x16xf32, #tpu.memory_space<vmem>>, vector<8x16xf32>
    tpu.vector_store %arg7[%c0_17, %c0_18], %21 {strides = array<i32>} : memref<8x16xf32, #tpu.memory_space<vmem>>, vector<8x16xf32>,
    return
  }
}

</mosaic_0001>

<bundles_post_ra>
// kernel: tpu_custom_call.1
= control target key start
LH: loop header
LB: loop body
LE: loop exit
PB: predicated region body
PF: predicated region fallthrough
CT: control target
= control target key end

     0   :  { %v481_v3 = vmov 0.0|0.0   ;;  %vm482_vm0 = vmmov 0   ;;  %v483_v6 = vmov 0.0   ;;  %s484_s11 = smov 64   ;;  %s675_s0 = inlined_call_operand.vmem [shape: f32[8,32], index: 0, kind: input, shape index: {}]   ;;  %s676_s1 = inlined_call_operand.vmem [shape: f32[32,64], index: 1, kind: input, shape index: {}]   ;;  %s677_s2 = inlined_call_operand.vmem [shape: f32[96,48], index: 2, kind: input, shape index: {}]   ;;  %s678_s3 = inlined_call_operand.vmem [shape: f32[144,16], index: 3, kind: input, shape index: {}]   ;;  %s679_s4 = inlined_call_operand.vmem [shape: f32[1,64], index: 4, kind: input, shape index: {}]   ;;  %s680_s5 = inlined_call_operand.vmem [shape: f32[1,48], index: 5, kind: input, shape index: {}]   ;;  %s681_s6 = inlined_call_operand.vmem [shape: f32[1,16], index: 6, kind: input, shape index: {}]   ;;  %s682_s7 = inlined_call_operand.hbm [shape: f32[8,16], index: 7, kind: output, shape index: {}]  }
   0x1   :  { %v28_v0 = vld [vmem:[%s676_s1] sm:$0xff]  ;;  %v29_v1 = vld [vmem:[%s676_s1 + $0x8] sm:$0xff]  ;;  %v30_v2 = vld [vmem:[%s676_s1 + $0x10] sm:$0xff]  ;;  %399 = vmatprep.subr.bf16.mxu1 %v481_v3  ;;  %369 = vmatprep.mubr.msk.f32.mxu1 %vm482_vm0, %v483_v6 }
   0x2   :  { %v400_v4 = vpack.c.bf16 %v29_v1, %v28_v0  ;;  %v31_v5 = vld [vmem:[%s676_s1 + $0x18] sm:$0xff]  ;;  %v27_v7 = vld [vmem:[%s675_s0] sm:$0xff]  ;;  %423 = vmatprep.subr.bf16.mxu0 %v481_v3  ;;  %v120_v10 = vld [vmem:[%s677_s2 + $0x8] sm:$0xff] }
   0x3   :  { %114 = vrot.lane.b32.xlu0 %v27_v7, %s484_s11  ;;  %v403_v8 = vpack.c.bf16 %v31_v5, %v30_v2  ;;  %v119_v9 = vld [vmem:[%s677_s2] sm:$0xff] }
   0x4   :  { %401 = vmatpush3.bf16.msra.mxu1 %v400_v4 }
   0x5   :  { %402 = vmatprep.subr.bf16.mxu1 %v481_v3 }
   0x6   :  { %12 = vsyncpa [#allocation3], 0  ;;  %vm39_vm1 = vcmask 261120   ;;  %v406_v11 = vpack.c.bf16 %v120_v10, %v119_v9  ;;  %v121_v12 = vld [vmem:[%s677_s2 + $0x10] sm:$0xff]  ;;  %v122_v13 = vld [vmem:[%s677_s2 + $0x18] sm:$0xff]  ;;  %s485_s11 = smov 48  }
   0x7   :  { %v409_v14 = vpack.c.bf16 %v122_v13, %v121_v12  ;;  %v123_v15 = vld [vmem:[%s677_s2 + $0x20] sm:$0xff]  ;;  %v124_v16 = vld [vmem:[%s677_s2 + $0x28] sm:$0xff]  ;;  %v125_v18 = vld [vmem:[%s677_s2 + $0x30] sm:$0xff]  ;;  %213 = vrot.lane.b32.xlu0 %v27_v7, %s485_s11  ;;  %vm117_vm2 = vcmask 523264   ;;  %vm138_vm3 = vcmask 785408   ;;  %s486_s30 = smov 80  }
   0x8   :  { %404 = vmatpush3.bf16.msra.mxu1 %v403_v8  ;;  %v412_v17 = vpack.c.bf16 %v124_v16, %v123_v15  ;;  %v126_v19 = vld [vmem:[%s677_s2 + $0x38] sm:$0xff]  ;;  %v127_v21 = vld [vmem:[%s677_s2 + $0x40] sm:$0xff]  ;;  %v128_v22 = vld [vmem:[%s677_s2 + $0x48] sm:$0xff]  ;;  %vm249_vm4 = vcmask 130048   ;;  %vm220_vm5 = vcmask 392192   ;;  %vm222_vm6 = vcmask 654336  }
   0x9   :  { %405 = vmatprep.subr.bf16.mxu1 %v481_v3  ;;  %v415_v20 = vpack.c.bf16 %v126_v19, %v125_v18  ;;  %v418_v23 = vpack.c.bf16 %v128_v22, %v127_v21  ;;  %v129_v24 = vld [vmem:[%s677_s2 + $0x50] sm:$0xff]  ;;  %v130_v25 = vld [vmem:[%s677_s2 + $0x58] sm:$0xff]  ;;  %v224_v27 = vld [vmem:[%s678_s3] sm:$0xff]  ;;  %s487_s24 = smov [#allocation2]  }
   0xa   :  { %v421_v26 = vpack.c.bf16 %v130_v25, %v129_v24  ;;  %v225_v28 = vld [vmem:[%s678_s3 + $0x8] sm:$0xff]  ;;  %v226_v29 = vld [vmem:[%s678_s3 + $0x10] sm:$0xff]  ;;  %v227_v31 = vld [vmem:[%s678_s3 + $0x18] sm:$0xff]  ;;  %s329_s25 = sshll.u32 %s487_s24, 4  ;;  %s330_s25 = int_to_ptr.vmem [resolvable:$true] %s329_s25 }
   0xb   :  { %370 = vmatmul.mubr.msk.f32.vlgmr.msra.gmra.mrb[0].mxu1 %vm39_vm1, %v27_v7  ;;  %v424_v30 = vpack.c.bf16 %v225_v28, %v224_v27  ;;  %v427_v32 = vpack.c.bf16 %v227_v31, %v226_v29  ;;  %v228_v33 = vld [vmem:[%s678_s3 + $0x20] sm:$0xff]  ;;  %v229_v34 = vld [vmem:[%s678_s3 + $0x28] sm:$0xff]  ;;  %v230_v38 = vld [vmem:[%s678_s3 + $0x30] sm:$0xff]  ;;  %p462_p1 = scmp.lt.s32.totalorder %s330_s25, %s330_s25 }
   0xc   :  { %407 = vmatpush3.bf16.msra.mxu1 %v406_v11  ;;  %396 = vmatprep.mubr.msk.f32.mxu1 %vm482_vm0, %v483_v6  ;;  %v337_v35 = vld [vmem:[%s679_s4] ss:$0 sm:$0xff]  ;;  %v430_v36 = vpack.c.bf16 %v229_v34, %v228_v33  ;;  %v231_v39 = vld [vmem:[%s678_s3 + $0x38] sm:$0xff]  ;;  %v233_v46 = vld [vmem:[%s678_s3 + $0x48] sm:$0xff] }
   0xd   :  { %408 = vmatprep.subr.bf16.mxu1 %v481_v3  ;;  %425 = vmatpush1.bf16.msra.mxu0 %v424_v30  ;;  %v433_v44 = vpack.c.bf16 %v231_v39, %v230_v38  ;;  %v232_v45 = vld [vmem:[%s678_s3 + $0x40] sm:$0xff]  ;;  %v234_v49 = vld [vmem:[%s678_s3 + $0x50] sm:$0xff]  ;;  %v235_v50 = vld [vmem:[%s678_s3 + $0x58] sm:$0xff] }
   0xe   :  { %426 = vmatprep.subr.bf16.mxu0 %v481_v3  ;;  %v436_v48 = vpack.c.bf16 %v233_v46, %v232_v45  ;;  %v439_v51 = vpack.c.bf16 %v235_v50, %v234_v49  ;;  %v236_v52 = vld [vmem:[%s678_s3 + $0x60] sm:$0xff]  ;;  %v237_v53 = vld [vmem:[%s678_s3 + $0x68] sm:$0xff]  ;;  %v238_v55 = vld [vmem:[%s678_s3 + $0x70] sm:$0xff] }
   0xf   :  { %v442_v54 = vpack.c.bf16 %v237_v53, %v236_v52  ;;  %v239_v56 = vld [vmem:[%s678_s3 + $0x78] sm:$0xff]  ;;  %v240_v58 = vld [vmem:[%s678_s3 + $0x80] sm:$0xff]  ;;  %v241_v59 = vld [vmem:[%s678_s3 + $0x88] sm:$0xff] }
  0x10   :  { %410 = vmatpush3.bf16.msra.mxu1 %v409_v14  ;;  %v445_v57 = vpack.c.bf16 %v239_v56, %v238_v55  ;;  %v448_v60 = vpack.c.bf16 %v241_v59, %v240_v58  ;;  %v339_v62 = vld [vmem:[%s680_s5] ss:$0 sm:$0xff]  ;;  %s457_s5 = scalar_lea.vmem %s330_s25, 128 }
  0x11   :  { %411 = vmatprep.subr.bf16.mxu1 %v481_v3  ;;  %428 = vmatpush1.bf16.msra.mxu0 %v427_v32  ;;  %v341_v6 = vld [vmem:[%s681_s6] ss:$0 sm:$0xff]  ;;  %p458_p0 = scmp.ne.s32.totalorder %s330_s25, %s457_s5  ;;  %p463_p2 = scmp.lt.s32.totalorder %s457_s5, %s457_s5 }
  0x12   :  { %429 = vmatprep.subr.bf16.mxu0 %v481_v3 }
  0x13   :  { %p464_p3 = por %p463_p2, %p462_p1 }
  0x14   :  { %413 = vmatpush3.bf16.msra.mxu1 %v412_v17 }
  0x15   :  { %414 = vmatprep.subr.bf16.mxu1 %v481_v3  ;;  %431 = vmatpush1.bf16.msra.mxu0 %v430_v36  ;;  %p465_p4 = pnand %p464_p3, %p458_p0 }
  0x16   :  { %432 = vmatprep.subr.bf16.mxu0 %v481_v3 }
  0x18   :  { %416 = vmatpush3.bf16.msra.mxu1 %v415_v20 }
  0x19   :  { %417 = vmatprep.subr.bf16.mxu1 %v481_v3  ;;  %434 = vmatpush1.bf16.msra.mxu0 %v433_v44 }
  0x1a   :  { %435 = vmatprep.subr.bf16.mxu0 %v481_v3 }
  0x1c   :  { %419 = vmatpush3.bf16.msra.mxu1 %v418_v23 }
  0x1d   :  { %420 = vmatprep.subr.bf16.mxu1 %v481_v3  ;;  %437 = vmatpush1.bf16.msra.mxu0 %v436_v48 }
  0x1e   :  { %438 = vmatprep.subr.bf16.mxu0 %v481_v3 }
  0x20   :  { %422 = vmatpush3.bf16.msra.mxu1 %v421_v26 }
  0x21   :  { %440 = vmatpush1.bf16.msra.mxu0 %v439_v51 }
  0x22   :  { %441 = vmatprep.subr.bf16.mxu0 %v481_v3 }
  0x25   :  { %443 = vmatpush1.bf16.msra.mxu0 %v442_v54 }
  0x26   :  { %444 = vmatprep.subr.bf16.mxu0 %v481_v3 }
  0x29   :  { %446 = vmatpush1.bf16.msra.mxu0 %v445_v57 }
  0x2a   :  { %447 = vmatprep.subr.bf16.mxu0 %v481_v3 }
  0x2d   :  { %449 = vmatpush1.bf16.msra.mxu0 %v448_v60 }
  0x75   :  { %v115_v42 = vpop.permute.xlu0 %114 }
  0x79   :  { %v214_v2 = vpop.permute.xlu0 %213 }
  0xde   :  { %v109_v37 = vpop.f32.mrb[0].mxu1 }
  0xdf   :  { %v110_v40 = vadd.f32 %v337_v35, %v109_v37  ;;  %v371_v41 = vpop.f32.mrb[1].mxu1 }
  0xe1   :  { %v113_v43 = vmax.f32 %v110_v40, 0.0 }
  0xe3   :  { %v118_v47 = vsel %vm117_vm2, %v113_v43, %v115_v42  ;;  %217 = vrot.lane.b32.xlu1 %v113_v43, %s486_s30 }
  0xe4   :  { %397 = vmatmul.mubr.msk.f32.vlgmr.msra.gmra.mrb[2].mxu1 %vm138_vm3, %v118_v47 }
 0x155   :  { %v218_v61 = vpop.permute.xlu1 %217 }
 0x156   :  { %342 = vmatprep.mubr.msk.f32.mxu0 %vm249_vm4, %v218_v61 }
 0x1b7   :  { %v208_v63 = vpop.f32.mrb[2].mxu1 }
 0x1b8   :  { %v209_v0 = vadd.f32 %v339_v62, %v208_v63  ;;  %v398_v1 = vpop.f32.mrb[3].mxu1 }
 0x1ba   :  { %v212_v3 = vmax.f32 %v209_v0, 0.0 }
 0x1bc   :  { %v221_v4 = vsel %vm220_vm5, %v212_v3, %v214_v2 }
 0x1bd   :  { %v223_v5 = vsel %vm222_vm6, %v221_v4, %v218_v61 }
 0x1be   :  { %317 = vmatmul.mubr.f32.vlgmr.msra.gmra.mrb[0].mxu0 %v223_v5 }
 0x291   :  { %v318_v7 = vpop.f32.mrb[0].mxu0 }
 0x292   :  { %v319_v8 = vadd.f32 %v341_v6, %v318_v7  ;;  %v320_v9 = vpop.f32.mrb[1].mxu0 }
 0x294   :  { %322 = vst.msk [vmem:[#allocation2] sm:$0xff] %vm249_vm4, %v319_v8 }
 0x295   :  { %468 = shalt.err (!%p465_p4)
}
 0x296   :  { %s469_s27 = scalar_lea.hbm %s682_s7, 128 }
 0x297   :  { %p470_p5 = scmp.ne.s32.totalorder %s682_s7, %s469_s27  ;;  %p473_p6 = scmp.lt.u32.totalorder %s469_s27, %s682_s7 }
 0x299   :  { %p475_p7 = pnand %p473_p6, %p470_p5 }
 0x29b   :  { %478 = shalt.err (!%p475_p7)
}
 0x29c   :  { %332 = dma.vmem_to_hbm [thread:$0]  %s330_s25, 128, %s682_s7, [#allocation3]  }
 0x29d   :  { %479 = dma.done.wait [#allocation3], 128  }
 0x29e   :  { %480 = vsyncadd [#allocation3], 4294967168 }
 0x29f   :  { %336 = vsyncpa [#allocation3], 1 }

</bundles_post_ra>
